<compile_context>
chip_gen: v7x
topology: tpu7x:2x2x1
jax: 0.10.0
libtpu: 0.0.40
codegen_flags: <defaults>
</compile_context>

<pallas_src>
import functools

import jax
import jax.numpy as jnp
from jax.experimental import pallas as pl
from jax.experimental.pallas import tpu as pltpu


# ----------------------------------------------------------------------------
# kernel
# ----------------------------------------------------------------------------
def gate_kernel(x_ref, w_ref, b_ref, out_ref, *, out_scale, temperature):
    x = x_ref[...]                                     # (tb, T, D)  f32
    tb, T, D = x.shape
    w = w_ref[...]                                     # (D, D)  == W.T
    b = b_ref[...]                                     # (1, D)

    # Linear layer: bf16 operands on the MXU, f32 accumulation.
    x2 = x.reshape(tb * T, D).astype(jnp.bfloat16)
    logits = jnp.dot(x2, w.astype(jnp.bfloat16),
                     preferred_element_type=jnp.float32)
    logits = logits.reshape(tb, T, D) + b
    if temperature != 1.0:                             # t == 1.0 in the module
        logits = logits * (1.0 / temperature)

    # softmax over the last axis (f32), denominator via EUP approx reciprocal.
    m = jnp.max(logits, axis=-1, keepdims=True)
    e = jnp.exp(logits - m)
    denom = jnp.sum(e, axis=-1, keepdims=True)
    out_ref[...] = (out_scale * e) * pl.reciprocal(denom, approx=True)


# ----------------------------------------------------------------------------
# wrapper
# ----------------------------------------------------------------------------
def gate_forward(x, w, b, *, temperature=1.0, tile_n=8):
    """Gate forward.  x: (N, T, D) f32, w: (D, D) (stored as W.T), b: (D,)."""
    N, T, D = x.shape
    out_scale = float(D)            # d_gate_output_dim == d_gate_input_dim

    tile_n = min(tile_n, N)
    while N % tile_n:               # pick a divisor of N (static Python ints)
        tile_n -= 1

    b2 = b.reshape(1, D)
    kern = functools.partial(gate_kernel, out_scale=out_scale,
                             temperature=float(temperature))
    return pl.pallas_call(
        kern,
        out_shape=jax.ShapeDtypeStruct((N, T, D), jnp.float32),
        grid=(N // tile_n,),
        in_specs=[
            # activations: tiled over the leading axis, pipelined by Pallas
            pl.BlockSpec((tile_n, T, D), lambda i: (i, 0, 0)),
            # weight / bias: full-array blocks, index_map constant -> resident
            pl.BlockSpec((D, D), lambda i: (0, 0)),
            pl.BlockSpec((1, D), lambda i: (0, 0)),
        ],
        out_specs=pl.BlockSpec((tile_n, T, D), lambda i: (i, 0, 0)),
        compiler_params=pltpu.CompilerParams(
            dimension_semantics=("parallel",),
            vmem_limit_bytes=32 * 1024 * 1024),
    )(x, w, b2)


# ----------------------------------------------------------------------------
# pure-JAX reference (exact f32 math)
# ----------------------------------------------------------------------------
def gate_reference(x, w, b, *, temperature=1.0):
    d = x.shape[-1]
    return d * jax.nn.softmax((x @ w + b) / temperature, axis=-1)


# ----------------------------------------------------------------------------
if __name__ == "__main__":
    # Small shapes consistent with the module: N stocks x T steps x D gate feats.
    # D chosen = 128 so the feature/softmax axis is lane-dense on TPU.
    N, T, D = 16, 8, 128

    key = jax.random.PRNGKey(0)
    kx, kw, kb = jax.random.split(key, 3)
    x = jax.random.normal(kx, (N, T, D), dtype=jnp.float32)
    w = (0.1 * jax.random.normal(kw, (D, D))).astype(jnp.float32)   # W.T layout
    b = (0.02 * jax.random.normal(kb, (D,))).astype(jnp.float32)

    fwd = jax.jit(functools.partial(gate_forward, tile_n=4))
    out = jax.block_until_ready(fwd(x, w, b))
    assert out.shape == (N, T, D)

    ref = gate_reference(x, w, b)
    # bf16 matmul operands + approx reciprocal -> compare with bf16-level tol.
    err = jnp.abs(out - ref)
    within_tol = bool(jnp.all(err <= 1e-2 + 3e-2 * jnp.abs(ref)))
    assert jnp.all(jnp.isfinite(out)) and within_tol, float(jnp.max(err))

    print("KERNEL_OK")
</pallas_src>

<mosaic_0001>
module attributes {stable_mosaic.version = 11 : i64} {
  func.func @gate_kernel(%arg0: i32, %arg1: memref<4x8x128xf32, #tpu.memory_space<vmem>>, %arg2: memref<128x128xf32, #tpu.memory_space<vmem>>, %arg3: memref<1x128xf32, #tpu.memory_space<vmem>>, %arg4: memref<4x8x128xf32, #tpu.memory_space<vmem>>) attributes {dimension_semantics = [#tpu.dimension_semantics<parallel>], iteration_bounds = array<i64: 4>, scalar_prefetch = 0 : i64, scratch_operands = 0 : i64, tpu.core_type = #tpu.core_type<tc>, window_params = [{transform_indices = @transform_0, window_bounds = array<i64: 4, 8, 128>}, {pipeline_mode = #tpu.pipeline_mode<synchronous>, transform_indices = @transform_1, window_bounds = array<i64: 128, 128>}, {pipeline_mode = #tpu.pipeline_mode<synchronous>, transform_indices = @transform_2, window_bounds = array<i64: 1, 128>}, {transform_indices = @transform_3, window_bounds = array<i64: 4, 8, 128>}]} {
    %c0 = arith.constant 0 : index
    %c0_0 = arith.constant 0 : index
    %c0_1 = arith.constant 0 : index
    %0 = vector.load %arg1[%c0, %c0_0, %c0_1] : memref<4x8x128xf32, #tpu.memory_space<vmem>>, vector<4x8x128xf32>
    %c0_2 = arith.constant 0 : index
    %c0_3 = arith.constant 0 : index
    %1 = vector.load %arg2[%c0_2, %c0_3] : memref<128x128xf32, #tpu.memory_space<vmem>>, vector<128x128xf32>
    %c0_4 = arith.constant 0 : index
    %c0_5 = arith.constant 0 : index
    %2 = vector.load %arg3[%c0_4, %c0_5] : memref<1x128xf32, #tpu.memory_space<vmem>>, vector<1x128xf32>
    %3 = vector.shape_cast %0 : vector<4x8x128xf32> to vector<32x128xf32>
    %4 = arith.truncf %3 : vector<32x128xf32> to vector<32x128xbf16>
    %5 = arith.truncf %1 : vector<128x128xf32> to vector<128x128xbf16>
    %cst = arith.constant dense<0.000000e+00> : vector<32x128xf32>
    %6 = tpu.matmul %4, %5, %cst {dimension_numbers = #tpu.dot_dimension_numbers<[1], [0], [0], [1], [0, 0, 1, 1], [], []>} : vector<32x128xbf16>, vector<128x128xbf16>, vector<32x128xf32> -> vector<32x128xf32>
    %7 = vector.shape_cast %6 : vector<32x128xf32> to vector<4x8x128xf32>
    %8 = vector.shape_cast %2 : vector<1x128xf32> to vector<1x1x128xf32>
    %9 = vector.broadcast %8 : vector<1x1x128xf32> to vector<4x8x128xf32>
    %10 = arith.addf %7, %9 : vector<4x8x128xf32>
    %cst_6 = arith.constant dense<0xFF800000> : vector<4x8xf32>
    %11 = vector.multi_reduction <maximumf>, %10, %cst_6 [2] : vector<4x8x128xf32> to vector<4x8xf32>
    %12 = vector.shape_cast %11 : vector<4x8xf32> to vector<4x8x1xf32>
    %13 = vector.broadcast %12 : vector<4x8x1xf32> to vector<4x8x128xf32>
    %14 = arith.subf %10, %13 : vector<4x8x128xf32>
    %15 = math.exp %14 : vector<4x8x128xf32>
    %cst_7 = arith.constant dense<0.000000e+00> : vector<4x8xf32>
    %16 = vector.multi_reduction <add>, %15, %cst_7 [2] : vector<4x8x128xf32> to vector<4x8xf32>
    %17 = vector.shape_cast %16 : vector<4x8xf32> to vector<4x8x1xf32>
    %cst_8 = arith.constant 1.280000e+02 : f32
    %18 = vector.broadcast %cst_8 : f32 to vector<4x8x128xf32>
    %19 = arith.mulf %18, %15 : vector<4x8x128xf32>
    %20 = tpu.reciprocal %17 {approx = true} : vector<4x8x1xf32> -> vector<4x8x1xf32>
    %21 = vector.broadcast %20 : vector<4x8x1xf32> to vector<4x8x128xf32>
    %22 = arith.mulf %19, %21 : vector<4x8x128xf32>
    %c0_9 = arith.constant 0 : index
    %c0_10 = arith.constant 0 : index
    %c0_11 = arith.constant 0 : index
    %23 = vector.load %arg4[%c0_9, %c0_10, %c0_11] : memref<4x8x128xf32, #tpu.memory_space<vmem>>, vector<4x8x128xf32>
    tpu.vector_store %arg4[%c0_9, %c0_10, %c0_11], %22 {strides = array<i32>} : memref<4x8x128xf32, #tpu.memory_space<vmem>>, vector<4x8x128xf32>,
    return
  }
  func.func @transform_0(%arg0: i32) -> (i32, i32, i32) {
    %c0_i32 = arith.constant 0 : i32
    %c0_i32_0 = arith.constant 0 : i32
    %c0_i32_1 = arith.constant 0 : i32
    return %arg0, %c0_i32, %c0_i32_0 : i32, i32, i32
  }
  func.func @transform_1(%arg0: i32) -> (i32, i32) {
    %c0_i32 = arith.constant 0 : i32
    %c0_i32_0 = arith.constant 0 : i32
    %c0_i32_1 = arith.constant 0 : i32
    return %c0_i32, %c0_i32_0 : i32, i32
  }
  func.func @transform_2(%arg0: i32) -> (i32, i32) {
    %c0_i32 = arith.constant 0 : i32
    %c0_i32_0 = arith.constant 0 : i32
    %c0_i32_1 = arith.constant 0 : i32
    return %c0_i32, %c0_i32_0 : i32, i32
  }
  func.func @transform_3(%arg0: i32) -> (i32, i32, i32) {
    %c0_i32 = arith.constant 0 : i32
    %c0_i32_0 = arith.constant 0 : i32
    %c0_i32_1 = arith.constant 0 : i32
    return %arg0, %c0_i32, %c0_i32_0 : i32, i32, i32
  }
}

</mosaic_0001>

<bundles_post_ra>
// kernel: gate_forward.1
= control target key start
LH: loop header
LB: loop body
LE: loop exit
PB: predicated region body
PF: predicated region fallthrough
CT: control target
= control target key end

     0   :  { %8 = vsyncpa [#allocation3], 0  ;;  %s932_s0 = inlined_call_operand.hbm [shape: f32[16,8,128], index: 0, kind: input, shape index: {}]   ;;  %s933_s1 = inlined_call_operand.hbm [shape: f32[128,128], index: 1, kind: input, shape index: {}]   ;;  %s934_s2 = inlined_call_operand.vmem [shape: f32[1,128], index: 2, kind: input, shape index: {}]   ;;  %s935_s3 = inlined_call_operand.hbm [shape: f32[16,8,128], index: 3, kind: output, shape index: {}]  }
   0x1   :  { %10 = vsyncpa [#allocation3 + $0x1], 0 }
   0x2   :  { %11 = vsyncpa [#allocation6], 0 }
   0x3   :  { %12 = vsyncpa [#allocation4], 0 }
   0x4   :  { %14 = vsyncpa [#allocation4 + $0x1], 0  ;;  %s721_s12 = smov 0   ;;  %s723_s13 = smov 0  }
   0x5   :  { %s725_s14 = smov 0   ;;  %s727_s15 = smov 0  }
   0x6 LB: > { %s742_s16 = sadd.s32 4294967295, %s692_s15   ;;  %s438_s17 = sadd.s32 4294967294, %s692_s15   ;;  %s692_s15 = sphi %s727_s15, %s954_s15   ;;  %s688_s14 = sphi %s725_s14, %s953_s14   ;;  %s684_s13 = sphi %s723_s13, %s952_s13   ;;  %s680_s12 = sphi %s721_s12, %s951_s12  }
   0x7   : > { %p40_p0 = scmp.ne.s32.totalorder %s684_s13, %s680_s12  ;;  %p936_p1 = scmp.eq.s32.totalorder %s742_s16, 0 }
   0x8   : > { %p112_p3 = scmp.eq.s32.totalorder %s438_s17, 3  ;;  %p439_p5 = scmp.ge.s32.totalorder %s692_s15, 1 }
   0x9   : > { %p751_p4 = por %p936_p1, %p40_p0  ;;  %p119_p7 = scmp.lt.s32.totalorder %s692_s15, 5 }
   0xa   : > { %p756_p6 = por %p112_p3, %p40_p0  ;;  %s694_s21 = smov [#allocation5]  }
   0xb   : > { %s939_s18 = scalar_select %p751_p4, 1, 0 }
   0xc   : > { %s940_s19 = scalar_select %p756_p6, 1, 0 }
   0xd   : > { %p761_p8 = pnand %p439_p5, %p119_p7  ;;  %s131_s22 = sshll.u32 %s694_s21, 4  ;;  %s132_s22 = int_to_ptr.vmem [resolvable:$true] %s131_s22 }
   0xe   : > { %s774_s24 = sadd.s32 1, %s692_s15   ;;  %s27_s25 = sadd.s32 1, %s688_s14 }
   0xf   : > { %s941_s20 = scalar_select %p761_p8, 1, 0 }
  0x10   : > { %p495_p9 = pneg %p761_p8  ;;  %s24_s26 = ssub.s32 %s692_s15, %s774_s24 }
  0x11   : > { %s564_s29 = scalar_lea.hbm %s933_s1, 2048 }
  0x12   : > { %p769_p10 = pnand %p495_p9, %p936_p1  ;;  %p565_p11 = scmp.ne.s32.totalorder %s933_s1, %s564_s29 }
  0x13   : > { %p571_p3 = scmp.lt.u32.totalorder %s564_s29, %s933_s1 }
  0x14   : > { %p566_p12 = pneg %p769_p10 }
  0x16   : > { %p567_p13 = pnand %p566_p12, %p565_p11 }
  0x18   : > { %p568_p0 = pneg %p567_p13 }
  0x1a   : > { %p573_p5 = pnand %p571_p3, %p568_p0 }
  0x1c   : > { %576 = shalt.err (!%p573_p5)
}
  0x1d   : > { %s577_s7 = scalar_lea.vmem %s132_s22, 2048  ;;  %p585_p2 = scmp.lt.s32.totalorder %s132_s22, %s132_s22 }
  0x1e   : > { %p578_p7 = scmp.ne.s32.totalorder %s132_s22, %s577_s7  ;;  %p586_p6 = scmp.lt.s32.totalorder %s577_s7, %s577_s7 }
  0x20   : > { %p580_p9 = pnand %p578_p7, %p566_p12  ;;  %p587_p4 = por %p586_p6, %p585_p2 }
  0x22   : > { %p581_p1 = pneg %p580_p9 }
  0x24   : > { %p588_p8 = pnand %p587_p4, %p581_p1 }
  0x26   : > { %591 = shalt.err (!%p588_p8)
}
  0x27   : > { %s695_s8 = smov 128   ;;  %s696_s9 = smov 8  }
  0x28   : > { %498 = dma.hbm_to_vmem [thread:$0]  (!%p769_p10), %s933_s1, 2048, %s132_s22, [#allocation6], %s695_s8, %s695_s8, %s696_s9  }
  0x29   : > { %p25_p1 = scmp.eq.s32.totalorder %s24_s26, 0  ;;  %p34_p2 = scmp.ne.s32.totalorder %s688_s14, %s684_s13 }
  0x2a   : > { %p35_p4 = scmp.eq.s32.totalorder %s692_s15, 0  ;;  %p508_p6 = scmp.lt.s32.totalorder %s692_s15, 4 }
  0x2b   : > { %s803_s17 = scalar_select %p25_p1, %s688_s14, %s27_s25  }
  0x2c   : > { %p36_p8 = por %p35_p4, %p34_p2  ;;  %p943_p11 = scmp.eq.s32.totalorder %s742_s16, 3 }
  0x2d   : > { %s148_s23 = sand.u32 1, %s688_s14   ;;  %s455_s27 = sshll.u32 %s692_s15, 9 }
  0x2e   : > { %p807_p12 = por %p943_p11, %p34_p2  ;;  %s442_s28 = sshll.u32 %s148_s23, 5 }
  0x2f   : > { %s816_s4 = scalar_lea.hbm %s932_s0, %s455_s27  ;;  %s152_s22 = scalar_lea.vmem [#allocation2], %s442_s28 }
  0x30   : > { %s159_s25 = sshll.u32 %s152_s22, 4  ;;  %p818_p10 = pnand %p508_p6, %p36_p8  ;;  %s822_s25 = int_to_ptr.vmem [resolvable:$true] %s159_s25 }
  0x31   : > { %s824_s5 = scalar_lea.sflag [#allocation3], %s148_s23  ;;  %s592_s6 = scalar_lea.hbm %s816_s4, 512 }
  0x32   : > { %p593_p13 = scmp.ne.s32.totalorder %s816_s4, %s592_s6  ;;  %p594_p0 = pneg %p818_p10 }
  0x33   : > { %s597_s11 = scalar_lea.hbm %s932_s0, 2048  ;;  %p598_p7 = scmp.lt.u32.totalorder %s816_s4, %s932_s0 }
  0x34   : > { %p595_p3 = pnand %p594_p0, %p593_p13  ;;  %p599_p9 = scmp.lt.u32.totalorder %s597_s11, %s592_s6 }
  0x35   : > { %p601_p2 = scmp.lt.u32.totalorder %s592_s6, %s816_s4 }
  0x36   : > { %p596_p5 = pneg %p595_p3  ;;  %p600_p1 = por %p599_p9, %p598_p7 }
  0x38   : > { %p602_p4 = por %p601_p2, %p600_p1 }
  0x3a   : > { %p603_p6 = pnand %p602_p4, %p596_p5 }
  0x3c   : > { %606 = shalt.err (!%p603_p6)
}
  0x3d   : > { %s607_s23 = scalar_lea.vmem %s822_s25, 512  ;;  %s697_s29 = smov [#allocation2]  }
  0x3e   : > { %p608_p8 = scmp.ne.s32.totalorder %s822_s25, %s607_s23  ;;  %s612_s30 = sshll.u32 %s697_s29, 4  ;;  %s613_s30 = int_to_ptr.vmem [resolvable:$false] %s612_s30 }
  0x3f   : > { %s614_s22 = scalar_lea.vmem %s613_s30, 1024  ;;  %p615_p3 = scmp.lt.s32.totalorder %s822_s25, %s613_s30 }
  0x40   : > { %p610_p11 = pnand %p608_p8, %p594_p0  ;;  %p616_p7 = scmp.lt.s32.totalorder %s614_s22, %s607_s23 }
  0x42   : > { %p611_p13 = pneg %p610_p11  ;;  %p617_p9 = por %p616_p7, %p615_p3 }
  0x44   : > { %p618_p1 = pnand %p617_p9, %p611_p13 }
  0x46   : > { %621 = shalt.err (!%p618_p1)
}
  0x47   : > { %502 = dma.hbm_to_vmem [thread:$0]  (!%p818_p10), %s816_s4, 512, %s822_s25, %s824_s5, %s695_s8, %s695_s8, %s696_s9  }
  0x48   : > { %p946_p0 = scmp.ne.s32.totalorder %s941_s20, 0 }
  0x49   : > { %s858_s6 = sand.u32 (!%p946_p0), 1, %s684_s13   ;;  %p947_p5 = scmp.ne.s32.totalorder (!%p946_p0), %s939_s18, 0 }
  0x4a   : > { %171 = sbr.rel (%p946_p0) target bundleno = 670 (0x29e), region = 32  ;;  %s446_s7 = sshll.u32 (!%p946_p0), %s858_s6, 5 }
  0x4b   : > { %s174_s10 = scalar_lea.sflag (!%p946_p0), [#allocation3], %s858_s6  ;;  %s864_s26 = scalar_lea.vmem (!%p946_p0), [#allocation2], %s446_s7 }
  0x51   : > { %667 = dma.done.wait (%p947_p5), %s174_s10, 512  }
  0x52   : > { %669 = vsyncadd (%p947_p5), %s174_s10, 4294966784  ;;  %p948_p10 = scmp.eq.s32.totalorder %s742_s16, 0 }
  0x54   : > { %671 = dma.done.wait (%p948_p10), [#allocation6], 2048   ;;  %p949_p2 = pmov %p948_p10 }
  0x55   : > { %v211_v0 = vld [vmem:[#allocation5] sm:$0xff]  ;;  %v212_v1 = vld [vmem:[#allocation5 + $0x8] sm:$0xff]  ;;  %v213_v2 = vld [vmem:[#allocation5 + $0x10] sm:$0xff]  ;;  %s203_s8 = scalar_lea.vmem [#allocation7], %s446_s7  ;;  %s456_s9 = sshll.u32 %s742_s16, 9 }
  0x56   : > { %673 = vsyncadd (%p949_p2), [#allocation6], 4294965248  ;;  %v230_v3 = vpack.c.bf16 %v212_v1, %v211_v0  ;;  %v214_v4 = vld [vmem:[#allocation5 + $0x18] sm:$0xff]  ;;  %v215_v6 = vld [vmem:[#allocation5 + $0x20] sm:$0xff]  ;;  %s355_s4 = sshll.u32 %s203_s8, 4  ;;  %s887_s11 = scalar_lea.hbm %s935_s3, %s456_s9  ;;  %s889_s4 = int_to_ptr.vmem [resolvable:$true] %s355_s4 }
  0x57   : > { %v231_v5 = vpack.c.bf16 %v214_v4, %v213_v2  ;;  %v216_v7 = vld [vmem:[#allocation5 + $0x28] sm:$0xff]  ;;  %v207_v9 = vld [vmem:[%s864_s26] sm:$0xff]  ;;  %v217_v11 = vld [vmem:[#allocation5 + $0x30] sm:$0xff]  ;;  %s342_s27 = scalar_lea.sflag [#allocation4], %s858_s6  ;;  %s622_s16 = scalar_lea.vmem %s889_s4, 512 }
  0x58   : > { %467 = vmatprep.subr.bf16.mxu0 %v230_v3  ;;  %v232_v8 = vpack.c.bf16 %v216_v7, %v215_v6  ;;  %v208_v10 = vld [vmem:[%s864_s26 + $0x8] sm:$0xff]  ;;  %v218_v12 = vld [vmem:[#allocation5 + $0x38] sm:$0xff]  ;;  %v219_v15 = vld [vmem:[#allocation5 + $0x40] sm:$0xff]  ;;  %p623_p4 = scmp.ne.s32.totalorder %s889_s4, %s622_s16  ;;  %s698_s28 = smov [#allocation7]  }
  0x59   : > { %468 = vmatpush3.bf16.msra.mxu0 %v230_v3  ;;  %v228_v13 = vpack.c.bf16 %v208_v10, %v207_v9  ;;  %v233_v14 = vpack.c.bf16 %v218_v12, %v217_v11  ;;  %v220_v16 = vld [vmem:[#allocation5 + $0x48] sm:$0xff]  ;;  %v221_v18 = vld [vmem:[#allocation5 + $0x50] sm:$0xff]  ;;  %v222_v19 = vld [vmem:[#allocation5 + $0x58] sm:$0xff]  ;;  %s626_s23 = sshll.u32 %s698_s28, 4  ;;  %s627_s23 = int_to_ptr.vmem [resolvable:$false] %s626_s23 }
  0x5a   : > { %469 = vmatprep.subr.bf16.mxu0 %v231_v5  ;;  %v234_v17 = vpack.c.bf16 %v220_v16, %v219_v15  ;;  %v235_v20 = vpack.c.bf16 %v222_v19, %v221_v18  ;;  %v223_v21 = vld [vmem:[#allocation5 + $0x60] sm:$0xff]  ;;  %v224_v22 = vld [vmem:[#allocation5 + $0x68] sm:$0xff]  ;;  %v225_v24 = vld [vmem:[#allocation5 + $0x70] sm:$0xff]  ;;  %p624_p6 = pnand %p623_p4, %p807_p12  ;;  %s628_s29 = scalar_lea.vmem %s627_s23, 1024 }
  0x5b   : > { %483 = vmatprep.mubr.bf16.mxu0 %v228_v13  ;;  %v236_v23 = vpack.c.bf16 %v224_v22, %v223_v21  ;;  %v226_v25 = vld [vmem:[#allocation5 + $0x78] sm:$0xff]  ;;  %v209_v27 = vld [vmem:[%s864_s26 + $0x10] sm:$0xff]  ;;  %v449_v30 = vld [vmem:[%s934_s2] ss:$0 sm:$0xff]  ;;  %p629_p11 = scmp.lt.s32.totalorder %s889_s4, %s627_s23  ;;  %p630_p13 = scmp.lt.s32.totalorder %s628_s29, %s622_s16 }
  0x5c   : > { %v237_v26 = vpack.c.bf16 %v226_v25, %v225_v24  ;;  %v210_v28 = vld [vmem:[%s864_s26 + $0x18] sm:$0xff]  ;;  %p625_p8 = pneg %p624_p6 }
  0x5d   : > { %470 = vmatpush3.bf16.msra.mxu0 %v231_v5  ;;  %v229_v29 = vpack.c.bf16 %v210_v28, %v209_v27  ;;  %p631_p3 = por %p630_p13, %p629_p11 }
  0x5e   : > { %471 = vmatprep.subr.bf16.mxu0 %v232_v8 }
  0x5f   : > { %p632_p7 = pnand %p631_p3, %p625_p8 }
  0x61   : > { %472 = vmatpush3.bf16.msra.mxu0 %v232_v8 }
  0x62   : > { %473 = vmatprep.subr.bf16.mxu0 %v233_v14 }
  0x65   : > { %474 = vmatpush3.bf16.msra.mxu0 %v233_v14 }
  0x66   : > { %475 = vmatprep.subr.bf16.mxu0 %v234_v17 }
  0x69   : > { %476 = vmatpush3.bf16.msra.mxu0 %v234_v17 }
  0x6a   : > { %477 = vmatprep.subr.bf16.mxu0 %v235_v20 }
  0x6d   : > { %478 = vmatpush3.bf16.msra.mxu0 %v235_v20 }
  0x6e   : > { %479 = vmatprep.subr.bf16.mxu0 %v236_v23 }
  0x71   : > { %480 = vmatpush3.bf16.msra.mxu0 %v236_v23 }
  0x72   : > { %481 = vmatprep.subr.bf16.mxu0 %v237_v26 }
  0x75   : > { %482 = vmatpush3.bf16.msra.mxu0 %v237_v26 }
  0x78   : > { %484 = vmatmul.mubr.bf16.vlgmr.msra.gmra.mrb[0].mxu0 %v229_v29 }
 0x14b   : > { %v485_v31 = vpop.f32.mrb[0].mxu0 }
 0x14c   : > { %v295_v32 = vadd.f32 %v485_v31, %v449_v30  ;;  %v272_v33 = vpop.f32.mrb[1].mxu0 }
 0x14d   : > { %v293_v34 = vadd.f32 %v449_v30, %v272_v33  ;;  %v486_v35 = vpop.f32.mrb[2].mxu0 }
 0x14e   : > { %301 = vmax.xlane.f32.xlu1 %v295_v32  ;;  %v275_v36 = vpop.f32.mrb[3].mxu0  ;;  %v296_v37 = vadd.f32 %v486_v35, %v449_v30 }
 0x14f   : > { %297 = vmax.xlane.f32.xlu0 %v293_v34  ;;  %v294_v38 = vadd.f32 %v449_v30, %v275_v36 }
 0x152   : > { %303 = vmax.xlane.f32.xlu1 %v296_v37 }
 0x153   : > { %299 = vmax.xlane.f32.xlu0 %v294_v38 }
 0x1db   : > { %v302_v39 = vpop.xlane.xlu1 %301 }
 0x1dc   : > { %v307_v40 = vsub.f32 %v295_v32, %v302_v39  ;;  %v298_v41 = vpop.xlane.xlu0 %297 }
 0x1dd   : > { %v305_v42 = vsub.f32 %v293_v34, %v298_v41 }
 0x1de   : > { %v313_v45 = vmul.f32 1.442695, %v307_v40 }
 0x1df   : > { %v309_v43 = vmul.f32 1.442695, %v305_v42  ;;  %v304_v44 = vpop.xlane.xlu1 %303 }
 0x1e0   : > { %v300_v46 = vpop.xlane.xlu0 %299  ;;  %v308_v47 = vsub.f32 %v296_v37, %v304_v44 }
 0x1e1   : > { %548 = vpow2.f32 %v309_v43  ;;  %v306_v48 = vsub.f32 %v294_v38, %v300_v46 }
 0x1e2   : > { %550 = vpow2.f32 %v313_v45  ;;  %v315_v50 = vmul.f32 1.442695, %v308_v47 }
 0x1e3   : > { %v311_v49 = vmul.f32 1.442695, %v306_v48 }
 0x1e5   : > { %552 = vpow2.f32 %v311_v49 }
 0x1e6   : > { %554 = vpow2.f32 %v315_v50 }
 0x1eb   : > { %v549_v51 = vpop.eup %548 }
 0x1ec   : > { %317 = vadd.xlane.f32.xlu0 %v549_v51  ;;  %v551_v52 = vpop.eup %550  ;;  %v325_v59 = vmul.f32 128.0, %v549_v51 }
 0x1ed   : > { %v327_v0 = vmul.f32 128.0, %v551_v52 }
 0x1ef   : > { %v553_v53 = vpop.eup %552 }
 0x1f0   : > { %321 = vadd.xlane.f32.xlu0 %v551_v52  ;;  %319 = vadd.xlane.f32.xlu1 %v553_v53  ;;  %v555_v54 = vpop.eup %554  ;;  %v326_v62 = vmul.f32 128.0, %v553_v53 }
 0x1f1   : > { %v328_v4 = vmul.f32 128.0, %v555_v54 }
 0x1f4   : > { %323 = vadd.xlane.f32.xlu1 %v555_v54 }
 0x279   : > { %v318_v55 = vpop.xlane.xlu0 %317 }
 0x27a   : > { %556 = vrcp.f32 %v318_v55 }
 0x27d   : > { %v320_v56 = vpop.xlane.xlu1 %319  ;;  %v322_v57 = vpop.xlane.xlu0 %321 }
 0x27e   : > { %558 = vrcp.f32 %v320_v56 }
 0x27f   : > { %560 = vrcp.f32 %v322_v57 }
 0x281   : > { %v324_v58 = vpop.xlane.xlu1 %323 }
 0x282   : > { %562 = vrcp.f32 %v324_v58 }
 0x284   : > { %v557_v60 = vpop.eup %556 }
 0x285   : > { %v333_v61 = vmul.f32 %v557_v60, %v325_v59 }
 0x287   : > { %337 = vst [vmem:[%s203_s8] sm:$0xff] %v333_v61 }
 0x288   : > { %v559_v63 = vpop.eup %558 }
 0x289   : > { %v561_v1 = vpop.eup %560  ;;  %v334_v2 = vmul.f32 %v559_v63, %v326_v62 }
 0x28a   : > { %v335_v3 = vmul.f32 %v561_v1, %v327_v0 }
 0x28b   : > { %338 = vst [vmem:[%s203_s8 + $0x8] sm:$0xff] %v334_v2 }
 0x28c   : > { %v563_v5 = vpop.eup %562  ;;  %339 = vst [vmem:[%s203_s8 + $0x10] sm:$0xff] %v335_v3 }
 0x28d   : > { %v336_v6 = vmul.f32 %v563_v5, %v328_v4 }
 0x28f   : > { %340 = vst [vmem:[%s203_s8 + $0x18] sm:$0xff] %v336_v6 }
 0x290   : > { %635 = shalt.err (!%p632_p7)
}
 0x291   : > { %s636_s30 = scalar_lea.hbm %s887_s11, 512  ;;  %s640_s10 = scalar_lea.hbm %s935_s3, 2048 }
 0x292   : > { %p637_p9 = scmp.ne.s32.totalorder %s887_s11, %s636_s30  ;;  %p641_p5 = scmp.lt.u32.totalorder %s887_s11, %s935_s3 }
 0x293   : > { %p642_p10 = scmp.lt.u32.totalorder %s640_s10, %s636_s30  ;;  %p644_p4 = scmp.lt.u32.totalorder %s636_s30, %s887_s11 }
 0x294   : > { %p638_p1 = pnand %p637_p9, %p807_p12 }
 0x295   : > { %p643_p2 = por %p642_p10, %p641_p5 }
 0x296   : > { %p639_p0 = pneg %p638_p1 }
 0x297   : > { %p645_p6 = por %p644_p4, %p643_p2 }
 0x299   : > { %p646_p8 = pnand %p645_p6, %p639_p0 }
 0x29b   : > { %649 = shalt.err (!%p646_p8)
}
 0x29c   : > { %s699_s20 = smov 128   ;;  %s700_s8 = smov 8  }
 0x29d   : > { %493 = dma.vmem_to_hbm [thread:$0]  (%p807_p12), %s889_s4, 512, %s887_s11, %s342_s27, %s699_s20, %s699_s20, %s700_s8  }
 0x29e PF: > { %p510_p11 = scmp.ge.s32.totalorder %s692_s15, 2  ;;  %s370_s9 = sand.u32 1, %s680_s12  }
 0x29f   : > { %p950_p13 = scmp.ne.s32.totalorder %s940_s19, 0  ;;  %s371_s25 = scalar_lea.sflag [#allocation4], %s370_s9 }
 0x2a1   : > { %p504_p3 = pnand %p510_p11, %p950_p13 }
 0x2a3   : > { %675 = dma.done.wait (!%p504_p3), %s371_s25, 512  }
 0x2a4   : > { %677 = vsyncadd (!%p504_p3), %s371_s25, 4294966784  ;;  %p17_p7 = scmp.ge.s32.totalorder %s774_s24, 6   ;;  %s951_s12 = smov %s684_s13 }
 0x2a5   : > { %s952_s13 = smov %s688_s14  ;;  %s953_s14 = smov %s803_s17 }
 0x2a6   : > { %s954_s15 = smov %s774_s24  ;;  %19 = sbr.rel (!%p17_p7) target bundleno = 6 (0x6), region = 81 }
 0x2ad   :  { %376 = vsyncpa [#allocation3], 1 }
 0x2ae   :  { %378 = vsyncpa [#allocation3 + $0x1], 1 }
 0x2af   :  { %379 = vsyncpa [#allocation6], 1 }
 0x2b0   :  { %380 = vsyncpa [#allocation4], 1 }
 0x2b1   :  { %382 = vsyncpa [#allocation4 + $0x1], 1 }

</bundles_post_ra>
